<compile_context>
chip_gen: v7x
topology: tpu7x:2x2x1
jax: 0.10.0
libtpu: 0.0.40
codegen_flags: <defaults>
</compile_context>

<pallas_src>
import functools

import jax
import jax.numpy as jnp
from jax import lax
from jax.experimental import pallas as pl
from jax.experimental.pallas import tpu as pltpu


# ---------------------------------------------------------------------------
# Kernel: per-(hw_split, batch) partial reductions over spatial tiles.
# ---------------------------------------------------------------------------
def _focal_tversky_partial_kernel(logits_ref, labels_ref,
                                  tp_ref, sp_ref, cnt_ref,
                                  *, hw_valid, hw_steps, needs_mask):
    # logits_ref: (C, hw) native dtype     labels_ref: (1, hw) int8/int32
    # tp/sp/cnt_ref: (C, 1) f32 outputs, resident across the hw ("arbitrary")
    # grid axis and therefore usable as accumulators.
    hb = pl.program_id(2)

    @pl.when(hb == 0)
    def _():
        tp_ref[...] = jnp.zeros_like(tp_ref)
        sp_ref[...] = jnp.zeros_like(sp_ref)
        cnt_ref[...] = jnp.zeros_like(cnt_ref)

    x = logits_ref[...].astype(jnp.float32)          # (C, hw) upcast in-kernel
    t = labels_ref[...].astype(jnp.int32)            # (1, hw)
    num_ch, hw = x.shape

    # Exact softmax over the channel axis (PyTorch dim=1); the channel axis is
    # fully resident in every block so HW tiling never changes the result.
    m = jnp.max(x, axis=0, keepdims=True)            # (1, hw)
    e = jnp.exp(x - m)                                # (C, hw)  (EUP)
    # One reciprocal per pixel + broadcast multiply instead of C divides.
    r = pl.reciprocal(jnp.sum(e, axis=0, keepdims=True), approx=False)
    p = e * r                                         # (C, hw)

    if needs_mask:
        # Zero out the HW padding added by the wrapper (static shapes, so this
        # branch is compiled in only when padding actually exists).
        start = (pl.program_id(0) * hw_steps + hb) * hw
        lane = lax.broadcasted_iota(jnp.int32, (1, hw), 1) + start
        p = jnp.where(lane < hw_valid, p, 0.0)

    # One-hot membership via a (C, 1) channel iota broadcast against the
    # (1, hw) labels; no float one-hot / full-tile iota is materialized.
    ch = lax.broadcasted_iota(jnp.int32, (num_ch, 1), 0)
    hit = ch == t                                     # (C, hw) bool

    # Only three reductions are needed (fp = sum_p - tp, fn = count - tp).
    tp_ref[...] += jnp.sum(jnp.where(hit, p, 0.0), axis=1, keepdims=True)
    sp_ref[...] += jnp.sum(p, axis=1, keepdims=True)
    cnt_ref[...] += jnp.sum(jnp.where(hit, 1.0, 0.0), axis=1, keepdims=True)


# ---------------------------------------------------------------------------
# Tile / grid planning against the real VMEM working set.
# ---------------------------------------------------------------------------
def _round_up(x, m):
    return ((x + m - 1) // m) * m


def _vmem_capacity_bytes():
    try:
        return int(pltpu.get_tpu_info().vmem_capacity_bytes)
    except Exception:
        return 64 << 20        # conservative fallback (safe on v7x as well)


def _plan_tiles(n_batch, num_ch, hw, logits_itemsize):
    """Returns (hw_tile, hw_blocks, n_splits, hw_steps, hw_pad, vmem_limit)."""
    vmem_cap = _vmem_capacity_bytes()
    small_vmem = vmem_cap <= (64 << 20)               # v7x-class parts
    vmem_limit = (40 << 20) if small_vmem else (64 << 20)
    target_ws = (20 << 20) if small_vmem else (40 << 20)

    # Per-pixel VMEM bytes of the real working set:
    #   * logits block, double-buffered, native dtype
    #   * labels block: ~32 B/pixel after sublane padding, double-buffered
    #   * ~4 live f32 (C, hw) temporaries inside the kernel
    per_lane = 2 * num_ch * logits_itemsize + 2 * 32 + 4 * num_ch * 4

    hw_ceil128 = _round_up(hw, 128)
    hw_tile = max(128, (target_ws // per_lane) // 128 * 128)
    hw_tile = min(hw_tile, 64 * 1024, hw_ceil128)     # cap for pipeline granularity

    hw_blocks = -(-hw // hw_tile)
    if n_batch == 1 and hw_blocks == 1 and hw_ceil128 >= 256:
        hw_blocks = 2           # give the second v7x TensorCore work when N == 1
    if hw_blocks >= 2 and hw_blocks % 2:
        hw_blocks += 1          # even block count -> clean 2-way hw split
    # Rebalance the tile so the padded tail stays small.
    hw_tile = _round_up(-(-hw // hw_blocks), 128)
    hw_pad = hw_blocks * hw_tile

    n_splits = 2 if (hw_blocks >= 2 and hw_blocks % 2 == 0) else 1
    hw_steps = hw_blocks // n_splits
    return hw_tile, hw_blocks, n_splits, hw_steps, hw_pad, vmem_limit


# ---------------------------------------------------------------------------
# Wrapper.
# ---------------------------------------------------------------------------
def focal_tversky_loss(output, target, *, beta, gamma, epsilon=1e-6):
    """output: (N, C, H, W) float logits; target: (N, H, W) integer labels."""
    N, C, H, W = output.shape
    HW = H * W
    itemsize = jnp.dtype(output.dtype).itemsize

    hw_tile, hw_blocks, n_splits, hw_steps, HW_pad, vmem_limit = _plan_tiles(
        N, C, HW, itemsize)

    logits = output.reshape(N, C, HW)                 # native dtype, no f32 copy
    labels = target.reshape(N, 1, HW).astype(jnp.int32)

    if HW_pad != HW:
        # TODO(synk): a ragged last block (masked DMA / pl.BoundedSlice) would
        # avoid this extra HBM copy of the logits when HW is not tile-aligned.
        pad = HW_pad - HW
        logits = jnp.pad(logits, ((0, 0), (0, 0), (0, pad)))
        labels = jnp.pad(labels, ((0, 0), (0, 0), (0, pad)), constant_values=-1)

    # int8 narrowing cuts label DMA traffic; labels >= 128 wrap, but any value
    # outside 0..C-1 never matches the channel iota, so the result is unchanged.
    label_dtype = jnp.int8 if C <= 127 else jnp.int32
    labels = labels.astype(label_dtype)

    kernel = functools.partial(
        _focal_tversky_partial_kernel,
        hw_valid=HW, hw_steps=hw_steps, needs_mask=(HW_pad != HW))

    def in_map(s, nb, hb):
        return (nb, 0, s * hw_steps + hb)

    def out_map(s, nb, hb):
        return (s * N + nb, 0, 0)

    part_shape = jax.ShapeDtypeStruct((n_splits * N, C, 1), jnp.float32)
    label_itemsize = jnp.dtype(label_dtype).itemsize
    cost = pl.CostEstimate(
        flops=int(10 * N * C * HW_pad),
        transcendentals=int(N * (C + 1) * HW_pad),
        bytes_accessed=int(N * C * HW_pad * itemsize
                           + N * HW_pad * label_itemsize
                           + 3 * n_splits * N * C * 4),
    )

    tp_p, sp_p, cnt_p = pl.pallas_call(
        kernel,
        out_shape=(part_shape, part_shape, part_shape),
        grid_spec=pltpu.PrefetchScalarGridSpec(
            num_scalar_prefetch=0,
            grid=(n_splits, N, hw_steps),
            in_specs=[
                # TODO(synk): pipeline_mode=pl.Buffered(3) on this spec is a
                # further knob for HBM-bound v5e once validated on that chip.
                pl.BlockSpec((None, C, hw_tile), in_map),
                pl.BlockSpec((None, 1, hw_tile), in_map),
            ],
            out_specs=[pl.BlockSpec((None, C, 1), out_map) for _ in range(3)],
        ),
        compiler_params=pltpu.CompilerParams(
            dimension_semantics=("parallel", "parallel", "arbitrary"),
            vmem_limit_bytes=vmem_limit,
        ),
        cost_estimate=cost,
    )(logits, labels)

    # Tiny (N, C) finalize stays in XLA so both parallel grid axes remain free
    # for megacore sharding.
    tp = jnp.sum(tp_p.reshape(n_splits, N, C), axis=0)
    sp = jnp.sum(sp_p.reshape(n_splits, N, C), axis=0)
    cnt = jnp.sum(cnt_p.reshape(n_splits, N, C), axis=0)

    # fp = sp - tp, fn = cnt - tp  =>  denom = beta*sp + (1-beta)*cnt + eps
    denom = float(beta) * sp + (1.0 - float(beta)) * cnt + float(epsilon)
    tversky = (tp + float(epsilon)) / denom
    # clamp: rounding can push tversky marginally above 1 -> NaN in the pow
    focal = jnp.maximum(1.0 - tversky, 0.0) ** float(gamma)
    return jnp.mean(focal)


# ---------------------------------------------------------------------------
# Pure-JAX reference (mirrors the PyTorch module).
# ---------------------------------------------------------------------------
def _reference(output, target, *, beta, gamma, epsilon=1e-6):
    N, C, H, W = output.shape
    oh = jax.nn.one_hot(target, C, dtype=jnp.float32).transpose(0, 3, 1, 2)
    p = jax.nn.softmax(output.astype(jnp.float32), axis=1)
    tp = jnp.sum(p * oh, axis=(2, 3))
    fn = jnp.sum(oh * (1 - p), axis=(2, 3))
    fp = jnp.sum(p * (1 - oh), axis=(2, 3))
    tv = (tp + epsilon) / (tp + beta * fp + (1 - beta) * fn + epsilon)
    return jnp.mean((1 - tv) ** gamma)


if __name__ == "__main__":
    # Module hyperparameters (deterministic, set in-script).
    beta, gamma = 0.7, 0.75

    key = jax.random.PRNGKey(0)
    k1, k2, k3, k4 = jax.random.split(key, 4)

    # Primary small example.
    N, C, H, W = 2, 4, 16, 16
    output = jax.random.normal(k1, (N, C, H, W), dtype=jnp.float32)
    target = jax.random.randint(k2, (N, H, W), 0, C, dtype=jnp.int32)
    loss = jax.block_until_ready(
        focal_tversky_loss(output, target, beta=beta, gamma=gamma))
    ref = _reference(output, target, beta=beta, gamma=gamma)
    assert jnp.allclose(loss, ref, rtol=2e-5, atol=1e-6), (loss, ref)

    # Non-128-multiple spatial size: exercises the pad + in-kernel lane mask.
    N2, C2, H2, W2 = 1, 5, 7, 9
    output2 = jax.random.normal(k3, (N2, C2, H2, W2), dtype=jnp.float32)
    target2 = jax.random.randint(k4, (N2, H2, W2), 0, C2, dtype=jnp.int32)
    loss2 = jax.block_until_ready(
        focal_tversky_loss(output2, target2, beta=beta, gamma=gamma))
    ref2 = _reference(output2, target2, beta=beta, gamma=gamma)
    assert jnp.allclose(loss2, ref2, rtol=2e-5, atol=1e-6), (loss2, ref2)

    print("KERNEL_OK")
</pallas_src>

<mosaic_0001>
module attributes {stable_mosaic.version = 11 : i64} {
  func.func @_focal_tversky_partial_kernel(%arg0: i32, %arg1: i32, %arg2: i32, %arg3: memref<1x4x256xf32, #tpu.memory_space<vmem>>, %arg4: memref<1x1x256xi8, #tpu.memory_space<vmem>>, %arg5: memref<1x4x1xf32, #tpu.memory_space<vmem>>, %arg6: memref<1x4x1xf32, #tpu.memory_space<vmem>>, %arg7: memref<1x4x1xf32, #tpu.memory_space<vmem>>) attributes {dimension_semantics = [#tpu.dimension_semantics<parallel>, #tpu.dimension_semantics<parallel>, #tpu.dimension_semantics<arbitrary>], iteration_bounds = array<i64: 1, 2, 1>, scalar_prefetch = 0 : i64, scratch_operands = 0 : i64, tpu.core_type = #tpu.core_type<tc>, window_params = [{transform_indices = @transform_0, window_bounds = array<i64: 1, 4, 256>}, {transform_indices = @transform_1, window_bounds = array<i64: 1, 1, 256>}, {transform_indices = @transform_2, window_bounds = array<i64: 1, 4, 1>}, {transform_indices = @transform_3, window_bounds = array<i64: 1, 4, 1>}, {transform_indices = @transform_4, window_bounds = array<i64: 1, 4, 1>}]} {
    %c0_i32 = arith.constant 0 : i32
    %0 = arith.cmpi eq, %arg2, %c0_i32 : i32
    %1 = arith.extui %0 : i1 to i32
    %c0_i32_0 = arith.constant 0 : i32
    %2 = arith.cmpi ne, %1, %c0_i32_0 : i32
    scf.if %2 {
      %cst_31 = arith.constant 0.000000e+00 : f32
      %51 = vector.broadcast %cst_31 : f32 to vector<4x1xf32>
      %c0_32 = arith.constant 0 : index
      %c0_33 = arith.constant 0 : index
      %c0_34 = arith.constant 0 : index
      %52 = vector.load %arg5[%c0_32, %c0_33, %c0_34] : memref<1x4x1xf32, #tpu.memory_space<vmem>>, vector<1x4x1xf32>
      %53 = vector.shape_cast %52 : vector<1x4x1xf32> to vector<4x1xf32>
      %54 = vector.shape_cast %51 : vector<4x1xf32> to vector<1x4x1xf32>
      tpu.vector_store %arg5[%c0_32, %c0_33, %c0_34], %54 {strides = array<i32>} : memref<1x4x1xf32, #tpu.memory_space<vmem>>, vector<1x4x1xf32>,
      %cst_35 = arith.constant 0.000000e+00 : f32
      %55 = vector.broadcast %cst_35 : f32 to vector<4x1xf32>
      %c0_36 = arith.constant 0 : index
      %c0_37 = arith.constant 0 : index
      %c0_38 = arith.constant 0 : index
      %56 = vector.load %arg6[%c0_36, %c0_37, %c0_38] : memref<1x4x1xf32, #tpu.memory_space<vmem>>, vector<1x4x1xf32>
      %57 = vector.shape_cast %56 : vector<1x4x1xf32> to vector<4x1xf32>
      %58 = vector.shape_cast %55 : vector<4x1xf32> to vector<1x4x1xf32>
      tpu.vector_store %arg6[%c0_36, %c0_37, %c0_38], %58 {strides = array<i32>} : memref<1x4x1xf32, #tpu.memory_space<vmem>>, vector<1x4x1xf32>,
      %cst_39 = arith.constant 0.000000e+00 : f32
      %59 = vector.broadcast %cst_39 : f32 to vector<4x1xf32>
      %c0_40 = arith.constant 0 : index
      %c0_41 = arith.constant 0 : index
      %c0_42 = arith.constant 0 : index
      %60 = vector.load %arg7[%c0_40, %c0_41, %c0_42] : memref<1x4x1xf32, #tpu.memory_space<vmem>>, vector<1x4x1xf32>
      %61 = vector.shape_cast %60 : vector<1x4x1xf32> to vector<4x1xf32>
      %62 = vector.shape_cast %59 : vector<4x1xf32> to vector<1x4x1xf32>
      tpu.vector_store %arg7[%c0_40, %c0_41, %c0_42], %62 {strides = array<i32>} : memref<1x4x1xf32, #tpu.memory_space<vmem>>, vector<1x4x1xf32>,
    } else {
    }
    %c0 = arith.constant 0 : index
    %c0_1 = arith.constant 0 : index
    %c0_2 = arith.constant 0 : index
    %3 = vector.load %arg3[%c0, %c0_1, %c0_2] : memref<1x4x256xf32, #tpu.memory_space<vmem>>, vector<1x4x256xf32>
    %4 = vector.shape_cast %3 : vector<1x4x256xf32> to vector<4x256xf32>
    %c0_3 = arith.constant 0 : index
    %c0_4 = arith.constant 0 : index
    %c0_5 = arith.constant 0 : index
    %5 = vector.load %arg4[%c0_3, %c0_4, %c0_5] : memref<1x1x256xi8, #tpu.memory_space<vmem>>, vector<1x1x256xi8>
    %6 = vector.shape_cast %5 : vector<1x1x256xi8> to vector<1x256xi8>
    %7 = arith.extsi %6 : vector<1x256xi8> to vector<1x256xi32>
    %cst = arith.constant dense<0xFF800000> : vector<256xf32>
    %8 = vector.multi_reduction <maximumf>, %4, %cst [0] : vector<4x256xf32> to vector<256xf32>
    %9 = vector.shape_cast %8 : vector<256xf32> to vector<1x256xf32>
    %10 = vector.broadcast %9 : vector<1x256xf32> to vector<4x256xf32>
    %11 = arith.subf %4, %10 : vector<4x256xf32>
    %12 = math.exp %11 : vector<4x256xf32>
    %cst_6 = arith.constant dense<0.000000e+00> : vector<256xf32>
    %13 = vector.multi_reduction <add>, %12, %cst_6 [0] : vector<4x256xf32> to vector<256xf32>
    %14 = vector.shape_cast %13 : vector<256xf32> to vector<1x256xf32>
    %15 = tpu.reciprocal %14 : vector<1x256xf32> -> vector<1x256xf32>
    %16 = vector.broadcast %15 : vector<1x256xf32> to vector<4x256xf32>
    %17 = arith.mulf %12, %16 : vector<4x256xf32>
    %18 = tpu.iota {dimensions = array<i32: 0>} : vector<4x1xi32>
    %19 = vector.broadcast %18 : vector<4x1xi32> to vector<4x256xi32>
    %20 = vector.broadcast %7 : vector<1x256xi32> to vector<4x256xi32>
    %21 = arith.cmpi eq, %19, %20 : vector<4x256xi32>
    %c0_7 = arith.constant 0 : index
    %c0_8 = arith.constant 0 : index
    %c0_9 = arith.constant 0 : index
    %22 = vector.load %arg5[%c0_7, %c0_8, %c0_9] : memref<1x4x1xf32, #tpu.memory_space<vmem>>, vector<1x4x1xf32>
    %23 = vector.shape_cast %22 : vector<1x4x1xf32> to vector<4x1xf32>
    %cst_10 = arith.constant 0.000000e+00 : f32
    %24 = vector.broadcast %cst_10 : f32 to vector<4x256xf32>
    %25 = arith.select %21, %17, %24 : vector<4x256xi1>, vector<4x256xf32>
    %cst_11 = arith.constant dense<0.000000e+00> : vector<4xf32>
    %26 = vector.multi_reduction <add>, %25, %cst_11 [1] : vector<4x256xf32> to vector<4xf32>
    %27 = vector.shape_cast %26 : vector<4xf32> to vector<4x1xf32>
    %28 = arith.addf %23, %27 : vector<4x1xf32>
    %c0_12 = arith.constant 0 : index
    %c0_13 = arith.constant 0 : index
    %c0_14 = arith.constant 0 : index
    %29 = vector.load %arg5[%c0_12, %c0_13, %c0_14] : memref<1x4x1xf32, #tpu.memory_space<vmem>>, vector<1x4x1xf32>
    %30 = vector.shape_cast %29 : vector<1x4x1xf32> to vector<4x1xf32>
    %31 = vector.shape_cast %28 : vector<4x1xf32> to vector<1x4x1xf32>
    tpu.vector_store %arg5[%c0_12, %c0_13, %c0_14], %31 {strides = array<i32>} : memref<1x4x1xf32, #tpu.memory_space<vmem>>, vector<1x4x1xf32>,
    %c0_15 = arith.constant 0 : index
    %c0_16 = arith.constant 0 : index
    %c0_17 = arith.constant 0 : index
    %32 = vector.load %arg6[%c0_15, %c0_16, %c0_17] : memref<1x4x1xf32, #tpu.memory_space<vmem>>, vector<1x4x1xf32>
    %33 = vector.shape_cast %32 : vector<1x4x1xf32> to vector<4x1xf32>
    %cst_18 = arith.constant dense<0.000000e+00> : vector<4xf32>
    %34 = vector.multi_reduction <add>, %17, %cst_18 [1] : vector<4x256xf32> to vector<4xf32>
    %35 = vector.shape_cast %34 : vector<4xf32> to vector<4x1xf32>
    %36 = arith.addf %33, %35 : vector<4x1xf32>
    %c0_19 = arith.constant 0 : index
    %c0_20 = arith.constant 0 : index
    %c0_21 = arith.constant 0 : index
    %37 = vector.load %arg6[%c0_19, %c0_20, %c0_21] : memref<1x4x1xf32, #tpu.memory_space<vmem>>, vector<1x4x1xf32>
    %38 = vector.shape_cast %37 : vector<1x4x1xf32> to vector<4x1xf32>
    %39 = vector.shape_cast %36 : vector<4x1xf32> to vector<1x4x1xf32>
    tpu.vector_store %arg6[%c0_19, %c0_20, %c0_21], %39 {strides = array<i32>} : memref<1x4x1xf32, #tpu.memory_space<vmem>>, vector<1x4x1xf32>,
    %c0_22 = arith.constant 0 : index
    %c0_23 = arith.constant 0 : index
    %c0_24 = arith.constant 0 : index
    %40 = vector.load %arg7[%c0_22, %c0_23, %c0_24] : memref<1x4x1xf32, #tpu.memory_space<vmem>>, vector<1x4x1xf32>
    %41 = vector.shape_cast %40 : vector<1x4x1xf32> to vector<4x1xf32>
    %cst_25 = arith.constant 1.000000e+00 : f32
    %cst_26 = arith.constant 0.000000e+00 : f32
    %42 = vector.broadcast %cst_25 : f32 to vector<4x256xf32>
    %43 = vector.broadcast %cst_26 : f32 to vector<4x256xf32>
    %44 = arith.select %21, %42, %43 : vector<4x256xi1>, vector<4x256xf32>
    %cst_27 = arith.constant dense<0.000000e+00> : vector<4xf32>
    %45 = vector.multi_reduction <add>, %44, %cst_27 [1] : vector<4x256xf32> to vector<4xf32>
    %46 = vector.shape_cast %45 : vector<4xf32> to vector<4x1xf32>
    %47 = arith.addf %41, %46 : vector<4x1xf32>
    %c0_28 = arith.constant 0 : index
    %c0_29 = arith.constant 0 : index
    %c0_30 = arith.constant 0 : index
    %48 = vector.load %arg7[%c0_28, %c0_29, %c0_30] : memref<1x4x1xf32, #tpu.memory_space<vmem>>, vector<1x4x1xf32>
    %49 = vector.shape_cast %48 : vector<1x4x1xf32> to vector<4x1xf32>
    %50 = vector.shape_cast %47 : vector<4x1xf32> to vector<1x4x1xf32>
    tpu.vector_store %arg7[%c0_28, %c0_29, %c0_30], %50 {strides = array<i32>} : memref<1x4x1xf32, #tpu.memory_space<vmem>>, vector<1x4x1xf32>,
    return
  }
  func.func @transform_0(%arg0: i32, %arg1: i32, %arg2: i32) -> (i32, i32, i32) {
    %c1_i32 = arith.constant 1 : i32
    %0 = arith.muli %arg0, %c1_i32 : i32
    %1 = arith.addi %0, %arg2 : i32
    %c0_i32 = arith.constant 0 : i32
    %c0_i32_0 = arith.constant 0 : i32
    return %arg1, %c0_i32, %1 : i32, i32, i32
  }
  func.func @transform_1(%arg0: i32, %arg1: i32, %arg2: i32) -> (i32, i32, i32) {
    %c1_i32 = arith.constant 1 : i32
    %0 = arith.muli %arg0, %c1_i32 : i32
    %1 = arith.addi %0, %arg2 : i32
    %c0_i32 = arith.constant 0 : i32
    %c0_i32_0 = arith.constant 0 : i32
    return %arg1, %c0_i32, %1 : i32, i32, i32
  }
  func.func @transform_2(%arg0: i32, %arg1: i32, %arg2: i32) -> (i32, i32, i32) {
    %c2_i32 = arith.constant 2 : i32
    %0 = arith.muli %arg0, %c2_i32 : i32
    %1 = arith.addi %0, %arg1 : i32
    %c0_i32 = arith.constant 0 : i32
    %c0_i32_0 = arith.constant 0 : i32
    %c0_i32_1 = arith.constant 0 : i32
    return %1, %c0_i32, %c0_i32_0 : i32, i32, i32
  }
  func.func @transform_3(%arg0: i32, %arg1: i32, %arg2: i32) -> (i32, i32, i32) {
    %c2_i32 = arith.constant 2 : i32
    %0 = arith.muli %arg0, %c2_i32 : i32
    %1 = arith.addi %0, %arg1 : i32
    %c0_i32 = arith.constant 0 : i32
    %c0_i32_0 = arith.constant 0 : i32
    %c0_i32_1 = arith.constant 0 : i32
    return %1, %c0_i32, %c0_i32_0 : i32, i32, i32
  }
  func.func @transform_4(%arg0: i32, %arg1: i32, %arg2: i32) -> (i32, i32, i32) {
    %c2_i32 = arith.constant 2 : i32
    %0 = arith.muli %arg0, %c2_i32 : i32
    %1 = arith.addi %0, %arg1 : i32
    %c0_i32 = arith.constant 0 : i32
    %c0_i32_0 = arith.constant 0 : i32
    %c0_i32_1 = arith.constant 0 : i32
    return %1, %c0_i32, %c0_i32_0 : i32, i32, i32
  }
}

</mosaic_0001>

<bundles_post_ra>
// kernel: tpu_custom_call.1
= control target key start
LH: loop header
LB: loop body
LE: loop exit
PB: predicated region body
PF: predicated region fallthrough
CT: control target
= control target key end

     0   :  { %10 = vsyncpa [#allocation3], 0  ;;  %s989_s0 = inlined_call_operand.hbm [shape: f32[2,4,256], index: 0, kind: input, shape index: {}]   ;;  %s990_s1 = inlined_call_operand.vmem [shape: s8[2,1,256], index: 1, kind: input, shape index: {}]   ;;  %s991_s2 = inlined_call_operand.vmem [shape: f32[2,4,1], index: 2, kind: output, shape index: {0}]   ;;  %s992_s3 = inlined_call_operand.vmem [shape: f32[2,4,1], index: 3, kind: output, shape index: {1}]   ;;  %s993_s4 = inlined_call_operand.vmem [shape: f32[2,4,1], index: 4, kind: output, shape index: {2}]  }
   0x1   :  { %12 = vsyncpa [#allocation3 + $0x1], 0  ;;  %s808_s15 = smov 0   ;;  %s810_s16 = smov 0  }
   0x2   :  { %s812_s17 = smov 0   ;;  %s814_s18 = smov 0  }
   0x3   :  { %s816_s19 = smov 0   ;;  %s818_s20 = smov 0  }
   0x4 LB: > { %s620_s21 = sadd.s32 4294967295, %s779_s20   ;;  %s33_s22 = sadd.s32 1, %s775_s19  ;;  %s779_s20 = sphi %s818_s20, %s18_s20   ;;  %s775_s19 = sphi %s816_s19, %s1007_s19   ;;  %s771_s18 = sphi %s814_s18, %s1006_s18   ;;  %s767_s17 = sphi %s812_s17, %s1005_s17   ;;  %s763_s16 = sphi %s810_s16, %s1004_s16   ;;  %s759_s15 = sphi %s808_s15, %s1003_s15  }
   0x5   : > { %p35_p0 = scmp.ge.s32.totalorder %s33_s22, 2  ;;  %s48_s23 = sadd.s32 1, %s767_s17 }
   0x6   : > { %p55_p1 = scmp.ne.s32.totalorder %s767_s17, %s763_s16  ;;  %p56_p2 = scmp.eq.s32.totalorder %s779_s20, 0 }
   0x7   : > { %s1009_s22 = smov (%p35_p0, %s33_s22), 0  ;;  %p61_p4 = scmp.ne.s32.totalorder %s763_s16, %s759_s15 }
   0x8   : > { %p844_p3 = por %p56_p2, %p55_p1  ;;  %s43_s25 = ssub.s32 %s775_s19, %s1009_s22 }
   0x9   : > { %p62_p5 = scmp.eq.s32.totalorder %s620_s21, 0  ;;  %p46_p6 = scmp.eq.s32.totalorder %s43_s25, 0 }
   0xa   : > { %p642_p8 = scmp.lt.s32.totalorder %s779_s20, 2  ;;  %s205_s28 = sand.u32 1, %s767_s17  }
   0xb   : > { %p851_p7 = por %p62_p5, %p61_p4  ;;  %s635_s29 = sshll.u32 %s775_s19, 7 }
   0xc   : > { %s857_s27 = scalar_select %p46_p6, %s767_s17, %s48_s23  }
   0xd   : > { %s624_s30 = sshll.u32 %s205_s28, 3  ;;  %s864_s7 = scalar_lea.hbm %s989_s0, %s635_s29 }
   0xe   : > { %s209_s8 = scalar_lea.vmem [#allocation2], %s624_s30  ;;  %p868_p9 = pnand %p642_p8, %p844_p3 }
   0xf   : > { %s220_s9 = sshll.u32 %s209_s8, 4  ;;  %s206_s11 = scalar_lea.sflag [#allocation3], %s205_s28  ;;  %s872_s9 = int_to_ptr.vmem [resolvable:$true] %s220_s9 }
  0x10   : > { %s699_s12 = scalar_lea.hbm %s864_s7, 128  ;;  %p701_p13 = pneg %p868_p9 }
  0x11   : > { %p700_p12 = scmp.ne.s32.totalorder %s864_s7, %s699_s12  ;;  %s704_s15 = scalar_lea.hbm %s989_s0, 256 }
  0x12   : > { %p705_p2 = scmp.lt.u32.totalorder %s864_s7, %s989_s0  ;;  %p706_p3 = scmp.lt.u32.totalorder %s704_s15, %s699_s12 }
  0x13   : > { %p702_p0 = pnand %p701_p13, %p700_p12  ;;  %p708_p5 = scmp.lt.u32.totalorder %s699_s12, %s864_s7 }
  0x14   : > { %p707_p4 = por %p706_p3, %p705_p2 }
  0x15   : > { %p703_p1 = pneg %p702_p0 }
  0x16   : > { %p709_p6 = por %p708_p5, %p707_p4 }
  0x18   : > { %p710_p8 = pnand %p709_p6, %p703_p1 }
  0x1a   : > { %713 = shalt.err (!%p710_p8)
}
  0x1b   : > { %s714_s24 = scalar_lea.vmem %s872_s9, 128  ;;  %s781_s25 = smov [#allocation2]  }
  0x1c   : > { %p715_p12 = scmp.ne.s32.totalorder %s872_s9, %s714_s24  ;;  %s719_s28 = sshll.u32 %s781_s25, 4  ;;  %s720_s28 = int_to_ptr.vmem [resolvable:$false] %s719_s28 }
  0x1d   : > { %s721_s29 = scalar_lea.vmem %s720_s28, 256  ;;  %p722_p11 = scmp.lt.s32.totalorder %s872_s9, %s720_s28 }
  0x1e   : > { %p717_p0 = pnand %p715_p12, %p701_p13  ;;  %p723_p2 = scmp.lt.s32.totalorder %s721_s29, %s714_s24 }
  0x20   : > { %p718_p10 = pneg %p717_p0  ;;  %p724_p3 = por %p723_p2, %p722_p11 }
  0x22   : > { %p725_p4 = pnand %p724_p3, %p718_p10 }
  0x24   : > { %728 = shalt.err (!%p725_p4)
}
  0x25   : > { %641 = dma.hbm_to_vmem [thread:$0]  (!%p868_p9), %s864_s7, 128, %s872_s9, %s206_s11  }
  0x26   : > { %p997_p1 = scmp.lt.s32.totalorder %s779_s20, 3  ;;  %p998_p5 = scmp.ge.s32.totalorder %s779_s20, 1 }
  0x28   : > { %p240_p13 = pnand %p998_p5, %p997_p1 }
  0x29   : > { %s245_s30 = sand.u32 (!%p240_p13), 1, %s763_s16  }
  0x2a   : > { %243 = sbr.rel (%p240_p13) target bundleno = 268 (0x10c), region = 28  ;;  %s628_s5 = sshll.u32 (!%p240_p13), %s245_s30, 3 }
  0x2b   : > { %s246_s6 = scalar_lea.sflag (!%p240_p13), [#allocation3], %s245_s30  ;;  %s249_s8 = scalar_lea.vmem (!%p240_p13), [#allocation2], %s628_s5 }
  0x31   : > { %754 = dma.done.wait (%p851_p7), %s246_s6, 128  }
  0x32   : > { %756 = vsyncadd (%p851_p7), %s246_s6, 4294967168  ;;  %p300_p10 = scmp.lt.s32.totalorder %s771_s18, 1  ;;  %v393_v0 = vlaneseq  ;;  %vm337_vm0 = vcmask 3072   ;;  %vm347_vm1 = vcmask 1043456   ;;  %v782_v4 = vmov 0.0   ;;  %v341_v5 = vld [vmem:[%s249_s8] sm:$0xff] }
  0x33   : > { %v345_v8 = vcombine.high %v341_v5, %v341_v5  ;;  %v348_v9 = vsel %vm347_vm1, %v341_v5, -inf }
  0x34   : > { %s1011_s18 = smov (!%p300_p10, %s771_s18), 1  ;;  %v394_v1 = vshrl.u32 %v393_v0, 7  ;;  %v349_v10 = vrot.slane %v348_v9, 4 }
  0x35   : > { %s629_s7 = sshll.u32 %s1011_s18, 1  ;;  %s912_s9 = sshll.u32 %s1011_s18, 2  ;;  %v355_v11 = vsel %vm347_vm1, %v345_v8, -inf }
  0x36   : > { %s306_s12 = scalar_lea.vmem %s990_s1, %s629_s7  ;;  %s921_s26 = scalar_lea.vmem %s991_s2, %s912_s9  ;;  %v397_v2 = vsub.s32 0, %v394_v1  ;;  %v401_v3 = vsub.s32 4, %v394_v1  ;;  %v350_v14 = vmax.f32 %v348_v9, %v349_v10  ;;  %v356_v15 = vrot.slane %v355_v11, 4 }
  0x37   : > { %338 = vst.msk [vmem:[%s921_s26] sm:$0xf] %vm337_vm0, %v782_v4  ;;  %v342_v6 = vld [vmem:[%s306_s12] sm:$0x3]  ;;  %s330_s21 = scalar_lea.vmem %s993_s4, %s912_s9  ;;  %s322_s25 = scalar_lea.vmem %s992_s3, %s912_s9 }
  0x38   : > { %v343_v7 = vunpack.c.0.s8 %v342_v6  ;;  %v351_v18 = vrot.slane %v350_v14, 2  ;;  %v357_v19 = vmax.f32 %v355_v11, %v356_v15  ;;  %340 = vst.msk [vmem:[%s330_s21] sm:$0xf] %vm337_vm0, %v782_v4  ;;  %339 = vst.msk [vmem:[%s322_s25] sm:$0xf] %vm337_vm0, %v782_v4 }
  0x3a   : > { %v398_v12 = vrot.slane %v343_v7, %v397_v2  ;;  %v402_v13 = vrot.slane %v343_v7, %v401_v3  ;;  %v352_v22 = vmax.f32 %v350_v14, %v351_v18  ;;  %v358_v23 = vrot.slane %v357_v19, 2 }
  0x3c   : > { %v406_v16 = vrot.slane %v398_v12, %v397_v2  ;;  %v410_v17 = vrot.slane %v402_v13, %v397_v2  ;;  %v353_v28 = vrot.slane %v352_v22, 1  ;;  %v359_v29 = vmax.f32 %v357_v19, %v358_v23 }
  0x3e   : > { %vm928_vm2 = vcmp.eq.s32.totalorder %v394_v1, %v406_v16  ;;  %vm932_vm3 = vcmp.eq.s32.totalorder %v394_v1, %v410_v17  ;;  %v354_v31 = vmax.f32 %v352_v22, %v353_v28  ;;  %v360_v32 = vrot.slane %v359_v29, 1  ;;  %v413_v6 = vld [vmem:[%s921_s26] sm:$0xf] }
  0x3f   : > { %v436_v24 = vsel %vm928_vm2, 1.0, %v782_v4  ;;  %v437_v25 = vsel %vm932_vm3, 1.0, %v782_v4  ;;  %v435_v2 = vld [vmem:[%s330_s21] sm:$0xf] }
  0x40   : > { %v438_v26 = vsel %vm347_vm1, %v436_v24, 0.0  ;;  %v439_v27 = vsel %vm347_vm1, %v437_v25, 0.0  ;;  %v361_v33 = vmax.f32 %v359_v29, %v360_v32  ;;  %v427_v9 = vld [vmem:[%s322_s25] sm:$0xf] }
  0x41   : > { %v440_v30 = vadd.f32 %v439_v27, %v438_v26 }
  0x42   : > { %v364_v34 = vcombine.low %v354_v31, %v361_v33 }
  0x43   : > { %441 = vadd.xlane.f32.xlu1 %v440_v30 }
  0x44   : > { %v366_v35 = vsub.f32 %v341_v5, %v364_v34 }
  0x46   : > { %v367_v36 = vmul.f32 1.442695, %v366_v35 }
  0x48   : > { %693 = vpow2.f32 %v367_v36 }
  0x52   : > { %v694_v37 = vpop.eup %693 }
  0x53   : > { %v370_v38 = vcombine.high %v694_v37, %v694_v37  ;;  %v372_v39 = vsel %vm347_vm1, %v694_v37, 0.0 }
  0x54   : > { %v373_v40 = vrot.slane %v372_v39, 4 }
  0x55   : > { %v379_v41 = vsel %vm347_vm1, %v370_v38, 0.0 }
  0x56   : > { %v374_v42 = vadd.f32 %v373_v40, %v372_v39  ;;  %v380_v43 = vrot.slane %v379_v41, 4 }
  0x58   : > { %v375_v44 = vrot.slane %v374_v42, 2  ;;  %v381_v45 = vadd.f32 %v380_v43, %v379_v41 }
  0x5a   : > { %v376_v46 = vadd.f32 %v375_v44, %v374_v42  ;;  %v382_v47 = vrot.slane %v381_v45, 2 }
  0x5c   : > { %v377_v48 = vrot.slane %v376_v46, 1  ;;  %v383_v49 = vadd.f32 %v382_v47, %v381_v45 }
  0x5e   : > { %v378_v50 = vadd.f32 %v377_v48, %v376_v46  ;;  %v384_v51 = vrot.slane %v383_v49, 1 }
  0x60   : > { %v385_v52 = vadd.f32 %v384_v51, %v383_v49  ;;  %695 = vrcp.f32 %v378_v50 }
  0x62   : > { %697 = vrcp.f32 %v385_v52 }
  0x6a   : > { %v696_v53 = vpop.eup %695 }
  0x6c   : > { %v698_v54 = vpop.eup %697 }
  0x6d   : > { %v390_v55 = vcombine.low %v696_v53, %v698_v54 }
  0x6f   : > { %v392_v56 = vmul.f32 %v694_v37, %v390_v55 }
  0x71   : > { %v415_v57 = vcombine.high %v392_v56, %v392_v56  ;;  %v417_v58 = vsel %vm928_vm2, %v392_v56, 0.0  ;;  %v428_v62 = vsel %vm347_vm1, %v392_v56, 0.0 }
  0x72   : > { %v419_v59 = vsel %vm347_vm1, %v417_v58, 0.0 }
  0x73   : > { %v418_v60 = vsel %vm932_vm3, %v415_v57, 0.0  ;;  %v429_v63 = vsel %vm347_vm1, %v415_v57, 0.0 }
  0x74   : > { %v420_v61 = vsel %vm347_vm1, %v418_v60, 0.0  ;;  %v430_v1 = vadd.f32 %v429_v63, %v428_v62 }
  0x75   : > { %v421_v0 = vadd.f32 %v420_v61, %v419_v59 }
  0x77   : > { %422 = vadd.xlane.f32.xlu0 %v421_v0 }
  0x7b   : > { %431 = vadd.xlane.f32.xlu0 %v430_v1 }
  0xd0   : > { %v442_v3 = vpop.xlane.xlu1 %441 }
  0xd1   : > { %v443_v5 = vadd.f32 %v442_v3, %v435_v2 }
  0xd3   : > { %444 = vst.msk [vmem:[%s330_s21] sm:$0xf] %vm337_vm0, %v443_v5 }
 0x104   : > { %v423_v7 = vpop.xlane.xlu0 %422 }
 0x105   : > { %v424_v8 = vadd.f32 %v423_v7, %v413_v6 }
 0x107   : > { %426 = vst.msk [vmem:[%s921_s26] sm:$0xf] %vm337_vm0, %v424_v8 }
 0x108   : > { %v432_v10 = vpop.xlane.xlu0 %431 }
 0x109   : > { %v433_v11 = vadd.f32 %v432_v10, %v427_v9 }
 0x10b   : > { %434 = vst.msk [vmem:[%s322_s25] sm:$0xf] %vm337_vm0, %v433_v11 }
 0x10c PF: > { %s18_s20 = sadd.s32 1, %s779_s20   ;;  %s1003_s15 = smov %s763_s16 }
 0x10d   : > { %p15_p7 = scmp.ge.s32.totalorder %s18_s20, 4   ;;  %s1004_s16 = smov %s767_s17 }
 0x10e   : > { %s1005_s17 = smov %s857_s27  ;;  %s1006_s18 = smov %s775_s19 }
 0x10f   : > { %s1007_s19 = smov %s1009_s22  ;;  %17 = sbr.rel (!%p15_p7) target bundleno = 4 (0x4), region = 99 }
 0x116   :  { %510 = vsyncpa [#allocation3], 1 }
 0x117   :  { %512 = vsyncpa [#allocation3 + $0x1], 1 }

</bundles_post_ra>
